<compile_context>
chip_gen: v5e
topology: v5e:2x2
jax: 0.10.0
libtpu: 0.0.40
codegen_flags: <defaults>
</compile_context>

<pallas_src>
import functools

import jax
import jax.numpy as jnp
from jax.experimental import pallas as pl
from jax.experimental.pallas import tpu as pltpu

LN_EPS = 1e-6   # matches nn.LayerNorm(embedding_dim, eps=1e-06) in the module


def _sigmoid(v):
    # exp on the EUP + approx reciprocal on the EUP keeps VALU slots free.
    return pl.reciprocal(1.0 + jnp.exp(-v), approx=True)


def _gated_fusion_kernel(
    x_ref, y_ref,            # (TM, D) bf16 input row tiles (streamed)
    b_ref,                   # (3, D) f32: rows = folded bx', folded by', bo
    wx_ref, wy_ref, wo_ref,  # (D, D) bf16 weights (pre-transposed, LN affine folded)
    o_ref,                   # (TM, D) output tile (caller dtype)
    *, x_gate: bool, n_sub: int,
):
    def layer_norm(v):       # gamma/beta already folded into wx/wy, bx/by
        mu = jnp.mean(v, axis=-1, keepdims=True)
        d = v - mu
        var = jnp.mean(d * d, axis=-1, keepdims=True)   # biased var (torch LN)
        return d * jax.lax.rsqrt(var + LN_EPS)

    bx = b_ref[0:1, :]
    by = b_ref[1:2, :]
    bo = b_ref[2:3, :]
    wx = wx_ref[...]
    wy = wy_ref[...]
    wo = wo_ref[...]

    tm = x_ref.shape[0]
    sub = tm // n_sub
    # Static unroll: independent chains let the LLO scheduler overlap one
    # sub-chunk's LN/sigmoid with the other's MXU matmuls (compute-bound D).
    for s in range(n_sub):
        rows = pl.ds(s * sub, sub)
        x = x_ref[rows, :].astype(jnp.float32)
        y = y_ref[rows, :].astype(jnp.float32)

        ln_x = layer_norm(x).astype(jnp.bfloat16)
        ln_y = layer_norm(y).astype(jnp.bfloat16)

        out_x = jnp.dot(ln_x, wx, preferred_element_type=jnp.float32) + bx
        out_y = jnp.dot(ln_y, wy, preferred_element_type=jnp.float32) + by

        if x_gate:
            gated = _sigmoid(out_x) * out_y
        else:
            gated = out_x * _sigmoid(out_y)

        out = jnp.dot(gated.astype(jnp.bfloat16), wo,
                      preferred_element_type=jnp.float32) + bo
        o_ref[rows, :] = out.astype(o_ref.dtype)


def _vmem_limit_bytes():
    """Generation-aware scoped-VMEM limit with headroom under physical VMEM."""
    cap = 64 * 1024 * 1024                      # conservative (v7x) fallback
    try:
        cap = int(pltpu.get_tpu_info().vmem_capacity_bytes)
    except Exception:
        pass
    return min(cap * 3 // 4, 100 * 1024 * 1024)  # 48 MiB on v7x, 96 MiB on v5e/v6e


def _max_tile_rows(d, vmem_limit):
    """Per-generation row-tile cap, clamped so weights + buffers fit VMEM."""
    cap = 512 if vmem_limit > 64 * 1024 * 1024 else 256   # v5e/v6e : v7x
    weight_bytes = 6 * d * d + 4 * 3 * d       # single-buffered bf16 W + f32 bias
    per_row = 40 * d                            # x/y bf16 (2 bufs) + out + headroom
    avail = vmem_limit - weight_bytes - (2 << 20)
    if avail > 8 * per_row:
        by_vmem = max(8, (avail // per_row) // 8 * 8)
    else:
        by_vmem = 8
    return max(8, min(cap, by_vmem))


def _select_tiling(n_rows, max_tile):
    """Pick (tile_rows, grid_m): multiple-of-8 tiles, >= 2 grid steps, preferring
    zero padding and an even step count (v7x two-TensorCore balance)."""
    best = None
    for t in range(8, max_tile + 1, 8):
        g = max(2, -(-n_rows // t))             # >= 2 steps for pipelining / 2 TCs
        pad = g * t - n_rows
        imbalance = t if (g % 2) else 0         # one idle-core tile worth of waste
        key = (pad + imbalance, g)              # tie-break: fewer, larger steps
        if best is None or key < best[0]:
            best = (key, t, g)
    return best[1], best[2]


def gated_fusion(x, y, params, *, x_gate=True, tile_rows=None):
    """x, y: (..., D). params: dict of LayerNorm + 3 Linear layers (torch layout)."""
    orig_shape = x.shape
    D = orig_shape[-1]
    xf = x.reshape(-1, D)
    yf = y.reshape(-1, D)
    N = xf.shape[0]

    vmem_limit = _vmem_limit_bytes()
    # TODO(synk): for D where three resident DxD bf16 weights no longer fit VMEM
    # (v7x: D >~ 3000 single-buffered), add a weight-column grid axis with a
    # K-accumulated fc_out matmul instead of full-weight residency.
    if tile_rows is None:
        tile_rows, grid_m = _select_tiling(N, _max_tile_rows(D, vmem_limit))
    else:
        assert tile_rows % 8 == 0, "row tile must be a multiple of 8 (f32 sublanes)"
        grid_m = max(2, -(-N // tile_rows))

    n_pad = grid_m * tile_rows

    # Stream activations in bf16 (halves HBM bytes); f32 math inside the kernel.
    xf = xf.astype(jnp.bfloat16)
    yf = yf.astype(jnp.bfloat16)
    if n_pad != N:                              # zero rows are LN-safe (var=0 + eps)
        xf = jnp.pad(xf, ((0, n_pad - N), (0, 0)))
        yf = jnp.pad(yf, ((0, n_pad - N), (0, 0)))

    # PyTorch Linear stores W as (out, in); pre-transpose so the kernel does x @ W.
    gamma = params["ln_gamma"].astype(jnp.float32)
    beta = params["ln_beta"].astype(jnp.float32)
    wx_t = params["wx"].T.astype(jnp.float32)
    wy_t = params["wy"].T.astype(jnp.float32)
    wo_t = params["wo"].T.astype(jnp.float32)

    # Fold the LayerNorm affine:  (d*g + b) @ W + c = d @ (g[:,None]*W) + (b@W + c)
    wx_f = (gamma[:, None] * wx_t).astype(jnp.bfloat16)
    wy_f = (gamma[:, None] * wy_t).astype(jnp.bfloat16)
    wo_f = wo_t.astype(jnp.bfloat16)
    bx_f = beta @ wx_t + params["bx"].astype(jnp.float32)
    by_f = beta @ wy_t + params["by"].astype(jnp.float32)
    bo_f = params["bo"].astype(jnp.float32)
    b_packed = jnp.stack([bx_f, by_f, bo_f], axis=0)          # (3, D) f32

    # Two statically-unrolled sub-chunks only when the shape is compute-bound.
    n_sub = 2 if (tile_rows % 16 == 0 and tile_rows >= 128 and D >= 512) else 1

    kernel = functools.partial(_gated_fusion_kernel, x_gate=x_gate, n_sub=n_sub)
    out_shape = jax.ShapeDtypeStruct((n_pad, D), x.dtype)
    cparams = pltpu.CompilerParams(
        dimension_semantics=("parallel",),
        vmem_limit_bytes=vmem_limit,
    )

    def call(single_buffer_invariants):
        row_spec = pl.BlockSpec((tile_rows, D), lambda i: (i, 0))
        if single_buffer_invariants:
            # Grid-invariant operands: one resident buffer is enough.
            w_spec = pl.BlockSpec((D, D), lambda i: (0, 0),
                                  pipeline_mode=pl.Buffered(1))
            b_spec = pl.BlockSpec((3, D), lambda i: (0, 0),
                                  pipeline_mode=pl.Buffered(1))
        else:
            w_spec = pl.BlockSpec((D, D), lambda i: (0, 0))
            b_spec = pl.BlockSpec((3, D), lambda i: (0, 0))
        return pl.pallas_call(
            kernel,
            out_shape=out_shape,
            grid_spec=pltpu.PrefetchScalarGridSpec(
                num_scalar_prefetch=0,
                grid=(grid_m,),
                in_specs=[row_spec, row_spec, b_spec, w_spec, w_spec, w_spec],
                out_specs=row_spec,
            ),
            compiler_params=cparams,
        )(xf, yf, b_packed, wx_f, wy_f, wo_f)

    try:
        out = call(True)
    except Exception:
        # Fallback if this jax build rejects Buffered(1) on grid-invariant specs.
        out = call(False)

    return out[:N].reshape(orig_shape)


def init_params(key, embedding_dim):
    """Matches the module init: xavier_normal_ weights, zero biases,
    LayerNorm gamma=1 / beta=0."""
    k1, k2, k3 = jax.random.split(key, 3)
    D = embedding_dim
    std = (2.0 / (D + D)) ** 0.5           # xavier normal for square layers
    return {
        "wx": jax.random.normal(k1, (D, D), jnp.float32) * std,  # (out, in)
        "bx": jnp.zeros((D,), jnp.float32),
        "wy": jax.random.normal(k2, (D, D), jnp.float32) * std,
        "by": jnp.zeros((D,), jnp.float32),
        "wo": jax.random.normal(k3, (D, D), jnp.float32) * std,
        "bo": jnp.zeros((D,), jnp.float32),
        "ln_gamma": jnp.ones((D,), jnp.float32),
        "ln_beta": jnp.zeros((D,), jnp.float32),
    }


def _reference(x, y, params, x_gate=True):
    """Pure-JAX f32 reference of the PyTorch forward."""
    def ln(v):
        mu = jnp.mean(v, axis=-1, keepdims=True)
        var = jnp.mean((v - mu) ** 2, axis=-1, keepdims=True)
        return (v - mu) / jnp.sqrt(var + LN_EPS) * params["ln_gamma"] + params["ln_beta"]

    out_x = ln(x) @ params["wx"].T + params["bx"]
    out_y = ln(y) @ params["wy"].T + params["by"]
    if x_gate:
        fused = jax.nn.sigmoid(out_x) * out_y
    else:
        fused = out_x * jax.nn.sigmoid(out_y)
    return fused @ params["wo"].T + params["bo"]


if __name__ == "__main__":
    batch, seq, embedding_dim = 2, 8, 128   # embedding_dim maps to the lane axis

    key = jax.random.PRNGKey(0)
    kx, ky, kp, ka = jax.random.split(key, 4)
    x = jax.random.normal(kx, (batch, seq, embedding_dim), jnp.float32)
    y = jax.random.normal(ky, (batch, seq, embedding_dim), jnp.float32)
    params = init_params(kp, embedding_dim)

    # Perturb the (module-default zero) biases / LN affine so the folded
    # weight/bias path is actually exercised by the correctness check.
    D = embedding_dim
    kb1, kb2, kb3, kg, kbt = jax.random.split(ka, 5)
    params["bx"] = 0.1 * jax.random.normal(kb1, (D,), jnp.float32)
    params["by"] = 0.1 * jax.random.normal(kb2, (D,), jnp.float32)
    params["bo"] = 0.1 * jax.random.normal(kb3, (D,), jnp.float32)
    params["ln_gamma"] = 1.0 + 0.1 * jax.random.normal(kg, (D,), jnp.float32)
    params["ln_beta"] = 0.1 * jax.random.normal(kbt, (D,), jnp.float32)

    for gate in (True, False):
        out = gated_fusion(x, y, params, x_gate=gate)
        out = jax.block_until_ready(out)
        ref = _reference(x, y, params, x_gate=gate)
        assert out.shape == (batch, seq, embedding_dim)
        # bf16 streamed inputs + bf16 MXU operands (f32 accumulation) + approx
        # reciprocal in sigmoid => looser tolerance than pure f32.
        err = float(jnp.max(jnp.abs(out - ref)))
        assert jnp.allclose(out, ref, atol=5e-2, rtol=5e-2), (
            f"mismatch vs reference (x_gate={gate}), max abs err {err}")

    print("KERNEL_OK")
</pallas_src>

<mosaic_0001>
module attributes {stable_mosaic.version = 11 : i64} {
  func.func @_gated_fusion_kernel(%arg0: i32, %arg1: memref<8x128xbf16, #tpu.memory_space<vmem>>, %arg2: memref<8x128xbf16, #tpu.memory_space<vmem>>, %arg3: memref<3x128xf32, #tpu.memory_space<vmem>>, %arg4: memref<128x128xbf16, #tpu.memory_space<vmem>>, %arg5: memref<128x128xbf16, #tpu.memory_space<vmem>>, %arg6: memref<128x128xbf16, #tpu.memory_space<vmem>>, %arg7: memref<8x128xf32, #tpu.memory_space<vmem>>) attributes {dimension_semantics = [#tpu.dimension_semantics<parallel>], iteration_bounds = array<i64: 2>, scalar_prefetch = 0 : i64, scratch_operands = 0 : i64, tpu.core_type = #tpu.core_type<tc>, window_params = [{transform_indices = @transform_0, window_bounds = array<i64: 8, 128>}, {transform_indices = @transform_1, window_bounds = array<i64: 8, 128>}, {pipeline_mode = #tpu.pipeline_mode<synchronous>, transform_indices = @transform_2, window_bounds = array<i64: 3, 128>}, {pipeline_mode = #tpu.pipeline_mode<synchronous>, transform_indices = @transform_3, window_bounds = array<i64: 128, 128>}, {pipeline_mode = #tpu.pipeline_mode<synchronous>, transform_indices = @transform_4, window_bounds = array<i64: 128, 128>}, {pipeline_mode = #tpu.pipeline_mode<synchronous>, transform_indices = @transform_5, window_bounds = array<i64: 128, 128>}, {transform_indices = @transform_6, window_bounds = array<i64: 8, 128>}]} {
    %c0 = arith.constant 0 : index
    %c0_0 = arith.constant 0 : index
    %0 = vector.load %arg3[%c0, %c0_0] : memref<3x128xf32, #tpu.memory_space<vmem>>, vector<1x128xf32>
    %c1 = arith.constant 1 : index
    %c0_1 = arith.constant 0 : index
    %1 = vector.load %arg3[%c1, %c0_1] : memref<3x128xf32, #tpu.memory_space<vmem>>, vector<1x128xf32>
    %c2 = arith.constant 2 : index
    %c0_2 = arith.constant 0 : index
    %2 = vector.load %arg3[%c2, %c0_2] : memref<3x128xf32, #tpu.memory_space<vmem>>, vector<1x128xf32>
    %c0_3 = arith.constant 0 : index
    %c0_4 = arith.constant 0 : index
    %3 = vector.load %arg4[%c0_3, %c0_4] : memref<128x128xbf16, #tpu.memory_space<vmem>>, vector<128x128xbf16>
    %c0_5 = arith.constant 0 : index
    %c0_6 = arith.constant 0 : index
    %4 = vector.load %arg5[%c0_5, %c0_6] : memref<128x128xbf16, #tpu.memory_space<vmem>>, vector<128x128xbf16>
    %c0_7 = arith.constant 0 : index
    %c0_8 = arith.constant 0 : index
    %5 = vector.load %arg6[%c0_7, %c0_8] : memref<128x128xbf16, #tpu.memory_space<vmem>>, vector<128x128xbf16>
    %c0_9 = arith.constant 0 : index
    %c0_10 = arith.constant 0 : index
    %6 = vector.load %arg1[%c0_9, %c0_10] : memref<8x128xbf16, #tpu.memory_space<vmem>>, vector<8x128xbf16>
    %7 = arith.extf %6 : vector<8x128xbf16> to vector<8x128xf32>
    %c0_11 = arith.constant 0 : index
    %c0_12 = arith.constant 0 : index
    %8 = vector.load %arg2[%c0_11, %c0_12] : memref<8x128xbf16, #tpu.memory_space<vmem>>, vector<8x128xbf16>
    %9 = arith.extf %8 : vector<8x128xbf16> to vector<8x128xf32>
    %cst = arith.constant dense<0.000000e+00> : vector<8xf32>
    %10 = vector.multi_reduction <add>, %7, %cst [1] : vector<8x128xf32> to vector<8xf32>
    %11 = vector.shape_cast %10 : vector<8xf32> to vector<8x1xf32>
    %cst_13 = arith.constant 1.280000e+02 : f32
    %12 = vector.broadcast %cst_13 : f32 to vector<8x1xf32>
    %13 = arith.divf %11, %12 : vector<8x1xf32>
    %14 = vector.broadcast %13 : vector<8x1xf32> to vector<8x128xf32>
    %15 = arith.subf %7, %14 : vector<8x128xf32>
    %16 = arith.mulf %15, %15 : vector<8x128xf32>
    %cst_14 = arith.constant dense<0.000000e+00> : vector<8xf32>
    %17 = vector.multi_reduction <add>, %16, %cst_14 [1] : vector<8x128xf32> to vector<8xf32>
    %18 = vector.shape_cast %17 : vector<8xf32> to vector<8x1xf32>
    %cst_15 = arith.constant 1.280000e+02 : f32
    %19 = vector.broadcast %cst_15 : f32 to vector<8x1xf32>
    %20 = arith.divf %18, %19 : vector<8x1xf32>
    %cst_16 = arith.constant 9.99999997E-7 : f32
    %21 = vector.broadcast %cst_16 : f32 to vector<8x1xf32>
    %22 = arith.addf %20, %21 : vector<8x1xf32>
    %23 = math.rsqrt %22 : vector<8x1xf32>
    %24 = vector.broadcast %23 : vector<8x1xf32> to vector<8x128xf32>
    %25 = arith.mulf %15, %24 : vector<8x128xf32>
    %26 = arith.truncf %25 : vector<8x128xf32> to vector<8x128xbf16>
    %cst_17 = arith.constant dense<0.000000e+00> : vector<8xf32>
    %27 = vector.multi_reduction <add>, %9, %cst_17 [1] : vector<8x128xf32> to vector<8xf32>
    %28 = vector.shape_cast %27 : vector<8xf32> to vector<8x1xf32>
    %cst_18 = arith.constant 1.280000e+02 : f32
    %29 = vector.broadcast %cst_18 : f32 to vector<8x1xf32>
    %30 = arith.divf %28, %29 : vector<8x1xf32>
    %31 = vector.broadcast %30 : vector<8x1xf32> to vector<8x128xf32>
    %32 = arith.subf %9, %31 : vector<8x128xf32>
    %33 = arith.mulf %32, %32 : vector<8x128xf32>
    %cst_19 = arith.constant dense<0.000000e+00> : vector<8xf32>
    %34 = vector.multi_reduction <add>, %33, %cst_19 [1] : vector<8x128xf32> to vector<8xf32>
    %35 = vector.shape_cast %34 : vector<8xf32> to vector<8x1xf32>
    %cst_20 = arith.constant 1.280000e+02 : f32
    %36 = vector.broadcast %cst_20 : f32 to vector<8x1xf32>
    %37 = arith.divf %35, %36 : vector<8x1xf32>
    %cst_21 = arith.constant 9.99999997E-7 : f32
    %38 = vector.broadcast %cst_21 : f32 to vector<8x1xf32>
    %39 = arith.addf %37, %38 : vector<8x1xf32>
    %40 = math.rsqrt %39 : vector<8x1xf32>
    %41 = vector.broadcast %40 : vector<8x1xf32> to vector<8x128xf32>
    %42 = arith.mulf %32, %41 : vector<8x128xf32>
    %43 = arith.truncf %42 : vector<8x128xf32> to vector<8x128xbf16>
    %cst_22 = arith.constant dense<0.000000e+00> : vector<8x128xf32>
    %44 = tpu.matmul %26, %3, %cst_22 {dimension_numbers = #tpu.dot_dimension_numbers<[1], [0], [0], [1], [0, 0, 1, 1], [], []>} : vector<8x128xbf16>, vector<128x128xbf16>, vector<8x128xf32> -> vector<8x128xf32>
    %45 = vector.broadcast %0 : vector<1x128xf32> to vector<8x128xf32>
    %46 = arith.addf %44, %45 : vector<8x128xf32>
    %cst_23 = arith.constant dense<0.000000e+00> : vector<8x128xf32>
    %47 = tpu.matmul %43, %4, %cst_23 {dimension_numbers = #tpu.dot_dimension_numbers<[1], [0], [0], [1], [0, 0, 1, 1], [], []>} : vector<8x128xbf16>, vector<128x128xbf16>, vector<8x128xf32> -> vector<8x128xf32>
    %48 = vector.broadcast %1 : vector<1x128xf32> to vector<8x128xf32>
    %49 = arith.addf %47, %48 : vector<8x128xf32>
    %cst_24 = arith.constant 0.000000e+00 : f32
    %50 = vector.broadcast %cst_24 : f32 to vector<8x128xf32>
    %51 = arith.subf %50, %46 : vector<8x128xf32>
    %52 = math.exp %51 : vector<8x128xf32>
    %cst_25 = arith.constant 1.000000e+00 : f32
    %53 = vector.broadcast %cst_25 : f32 to vector<8x128xf32>
    %54 = arith.addf %53, %52 : vector<8x128xf32>
    %55 = tpu.reciprocal %54 {approx = true} : vector<8x128xf32> -> vector<8x128xf32>
    %56 = arith.mulf %55, %49 : vector<8x128xf32>
    %57 = arith.truncf %56 : vector<8x128xf32> to vector<8x128xbf16>
    %cst_26 = arith.constant dense<0.000000e+00> : vector<8x128xf32>
    %58 = tpu.matmul %57, %5, %cst_26 {dimension_numbers = #tpu.dot_dimension_numbers<[1], [0], [0], [1], [0, 0, 1, 1], [], []>} : vector<8x128xbf16>, vector<128x128xbf16>, vector<8x128xf32> -> vector<8x128xf32>
    %59 = vector.broadcast %2 : vector<1x128xf32> to vector<8x128xf32>
    %60 = arith.addf %58, %59 : vector<8x128xf32>
    %c0_27 = arith.constant 0 : index
    %c0_28 = arith.constant 0 : index
    %61 = vector.load %arg7[%c0_27, %c0_28] : memref<8x128xf32, #tpu.memory_space<vmem>>, vector<8x128xf32>
    tpu.vector_store %arg7[%c0_27, %c0_28], %60 {strides = array<i32>} : memref<8x128xf32, #tpu.memory_space<vmem>>, vector<8x128xf32>,
    return
  }
  func.func @transform_0(%arg0: i32) -> (i32, i32) {
    %c0_i32 = arith.constant 0 : i32
    %c0_i32_0 = arith.constant 0 : i32
    return %arg0, %c0_i32 : i32, i32
  }
  func.func @transform_1(%arg0: i32) -> (i32, i32) {
    %c0_i32 = arith.constant 0 : i32
    %c0_i32_0 = arith.constant 0 : i32
    return %arg0, %c0_i32 : i32, i32
  }
  func.func @transform_2(%arg0: i32) -> (i32, i32) {
    %c0_i32 = arith.constant 0 : i32
    %c0_i32_0 = arith.constant 0 : i32
    %c0_i32_1 = arith.constant 0 : i32
    return %c0_i32, %c0_i32_0 : i32, i32
  }
  func.func @transform_3(%arg0: i32) -> (i32, i32) {
    %c0_i32 = arith.constant 0 : i32
    %c0_i32_0 = arith.constant 0 : i32
    %c0_i32_1 = arith.constant 0 : i32
    return %c0_i32, %c0_i32_0 : i32, i32
  }
  func.func @transform_4(%arg0: i32) -> (i32, i32) {
    %c0_i32 = arith.constant 0 : i32
    %c0_i32_0 = arith.constant 0 : i32
    %c0_i32_1 = arith.constant 0 : i32
    return %c0_i32, %c0_i32_0 : i32, i32
  }
  func.func @transform_5(%arg0: i32) -> (i32, i32) {
    %c0_i32 = arith.constant 0 : i32
    %c0_i32_0 = arith.constant 0 : i32
    %c0_i32_1 = arith.constant 0 : i32
    return %c0_i32, %c0_i32_0 : i32, i32
  }
  func.func @transform_6(%arg0: i32) -> (i32, i32) {
    %c0_i32 = arith.constant 0 : i32
    %c0_i32_0 = arith.constant 0 : i32
    return %arg0, %c0_i32 : i32, i32
  }
}

module attributes {stable_mosaic.version = 11 : i64} {
  func.func @_gated_fusion_kernel(%arg0: i32, %arg1: memref<8x128xbf16, #tpu.memory_space<vmem>>, %arg2: memref<8x128xbf16, #tpu.memory_space<vmem>>, %arg3: memref<3x128xf32, #tpu.memory_space<vmem>>, %arg4: memref<128x128xbf16, #tpu.memory_space<vmem>>, %arg5: memref<128x128xbf16, #tpu.memory_space<vmem>>, %arg6: memref<128x128xbf16, #tpu.memory_space<vmem>>, %arg7: memref<8x128xf32, #tpu.memory_space<vmem>>) attributes {dimension_semantics = [#tpu.dimension_semantics<parallel>], iteration_bounds = array<i64: 2>, scalar_prefetch = 0 : i64, scratch_operands = 0 : i64, tpu.core_type = #tpu.core_type<tc>, window_params = [{transform_indices = @transform_0, window_bounds = array<i64: 8, 128>}, {transform_indices = @transform_1, window_bounds = array<i64: 8, 128>}, {pipeline_mode = #tpu.pipeline_mode<synchronous>, transform_indices = @transform_2, window_bounds = array<i64: 3, 128>}, {pipeline_mode = #tpu.pipeline_mode<synchronous>, transform_indices = @transform_3, window_bounds = array<i64: 128, 128>}, {pipeline_mode = #tpu.pipeline_mode<synchronous>, transform_indices = @transform_4, window_bounds = array<i64: 128, 128>}, {pipeline_mode = #tpu.pipeline_mode<synchronous>, transform_indices = @transform_5, window_bounds = array<i64: 128, 128>}, {transform_indices = @transform_6, window_bounds = array<i64: 8, 128>}]} {
    %c0 = arith.constant 0 : index
    %c0_0 = arith.constant 0 : index
    %0 = vector.load %arg3[%c0, %c0_0] : memref<3x128xf32, #tpu.memory_space<vmem>>, vector<1x128xf32>
    %c1 = arith.constant 1 : index
    %c0_1 = arith.constant 0 : index
    %1 = vector.load %arg3[%c1, %c0_1] : memref<3x128xf32, #tpu.memory_space<vmem>>, vector<1x128xf32>
    %c2 = arith.constant 2 : index
    %c0_2 = arith.constant 0 : index
    %2 = vector.load %arg3[%c2, %c0_2] : memref<3x128xf32, #tpu.memory_space<vmem>>, vector<1x128xf32>
    %c0_3 = arith.constant 0 : index
    %c0_4 = arith.constant 0 : index
    %3 = vector.load %arg4[%c0_3, %c0_4] : memref<128x128xbf16, #tpu.memory_space<vmem>>, vector<128x128xbf16>
    %c0_5 = arith.constant 0 : index
    %c0_6 = arith.constant 0 : index
    %4 = vector.load %arg5[%c0_5, %c0_6] : memref<128x128xbf16, #tpu.memory_space<vmem>>, vector<128x128xbf16>
    %c0_7 = arith.constant 0 : index
    %c0_8 = arith.constant 0 : index
    %5 = vector.load %arg6[%c0_7, %c0_8] : memref<128x128xbf16, #tpu.memory_space<vmem>>, vector<128x128xbf16>
    %c0_9 = arith.constant 0 : index
    %c0_10 = arith.constant 0 : index
    %6 = vector.load %arg1[%c0_9, %c0_10] : memref<8x128xbf16, #tpu.memory_space<vmem>>, vector<8x128xbf16>
    %7 = arith.extf %6 : vector<8x128xbf16> to vector<8x128xf32>
    %c0_11 = arith.constant 0 : index
    %c0_12 = arith.constant 0 : index
    %8 = vector.load %arg2[%c0_11, %c0_12] : memref<8x128xbf16, #tpu.memory_space<vmem>>, vector<8x128xbf16>
    %9 = arith.extf %8 : vector<8x128xbf16> to vector<8x128xf32>
    %cst = arith.constant dense<0.000000e+00> : vector<8xf32>
    %10 = vector.multi_reduction <add>, %7, %cst [1] : vector<8x128xf32> to vector<8xf32>
    %11 = vector.shape_cast %10 : vector<8xf32> to vector<8x1xf32>
    %cst_13 = arith.constant 1.280000e+02 : f32
    %12 = vector.broadcast %cst_13 : f32 to vector<8x1xf32>
    %13 = arith.divf %11, %12 : vector<8x1xf32>
    %14 = vector.broadcast %13 : vector<8x1xf32> to vector<8x128xf32>
    %15 = arith.subf %7, %14 : vector<8x128xf32>
    %16 = arith.mulf %15, %15 : vector<8x128xf32>
    %cst_14 = arith.constant dense<0.000000e+00> : vector<8xf32>
    %17 = vector.multi_reduction <add>, %16, %cst_14 [1] : vector<8x128xf32> to vector<8xf32>
    %18 = vector.shape_cast %17 : vector<8xf32> to vector<8x1xf32>
    %cst_15 = arith.constant 1.280000e+02 : f32
    %19 = vector.broadcast %cst_15 : f32 to vector<8x1xf32>
    %20 = arith.divf %18, %19 : vector<8x1xf32>
    %cst_16 = arith.constant 9.99999997E-7 : f32
    %21 = vector.broadcast %cst_16 : f32 to vector<8x1xf32>
    %22 = arith.addf %20, %21 : vector<8x1xf32>
    %23 = math.rsqrt %22 : vector<8x1xf32>
    %24 = vector.broadcast %23 : vector<8x1xf32> to vector<8x128xf32>
    %25 = arith.mulf %15, %24 : vector<8x128xf32>
    %26 = arith.truncf %25 : vector<8x128xf32> to vector<8x128xbf16>
    %cst_17 = arith.constant dense<0.000000e+00> : vector<8xf32>
    %27 = vector.multi_reduction <add>, %9, %cst_17 [1] : vector<8x128xf32> to vector<8xf32>
    %28 = vector.shape_cast %27 : vector<8xf32> to vector<8x1xf32>
    %cst_18 = arith.constant 1.280000e+02 : f32
    %29 = vector.broadcast %cst_18 : f32 to vector<8x1xf32>
    %30 = arith.divf %28, %29 : vector<8x1xf32>
    %31 = vector.broadcast %30 : vector<8x1xf32> to vector<8x128xf32>
    %32 = arith.subf %9, %31 : vector<8x128xf32>
    %33 = arith.mulf %32, %32 : vector<8x128xf32>
    %cst_19 = arith.constant dense<0.000000e+00> : vector<8xf32>
    %34 = vector.multi_reduction <add>, %33, %cst_19 [1] : vector<8x128xf32> to vector<8xf32>
    %35 = vector.shape_cast %34 : vector<8xf32> to vector<8x1xf32>
    %cst_20 = arith.constant 1.280000e+02 : f32
    %36 = vector.broadcast %cst_20 : f32 to vector<8x1xf32>
    %37 = arith.divf %35, %36 : vector<8x1xf32>
    %cst_21 = arith.constant 9.99999997E-7 : f32
    %38 = vector.broadcast %cst_21 : f32 to vector<8x1xf32>
    %39 = arith.addf %37, %38 : vector<8x1xf32>
    %40 = math.rsqrt %39 : vector<8x1xf32>
    %41 = vector.broadcast %40 : vector<8x1xf32> to vector<8x128xf32>
    %42 = arith.mulf %32, %41 : vector<8x128xf32>
    %43 = arith.truncf %42 : vector<8x128xf32> to vector<8x128xbf16>
    %cst_22 = arith.constant dense<0.000000e+00> : vector<8x128xf32>
    %44 = tpu.matmul %26, %3, %cst_22 {dimension_numbers = #tpu.dot_dimension_numbers<[1], [0], [0], [1], [0, 0, 1, 1], [], []>} : vector<8x128xbf16>, vector<128x128xbf16>, vector<8x128xf32> -> vector<8x128xf32>
    %45 = vector.broadcast %0 : vector<1x128xf32> to vector<8x128xf32>
    %46 = arith.addf %44, %45 : vector<8x128xf32>
    %cst_23 = arith.constant dense<0.000000e+00> : vector<8x128xf32>
    %47 = tpu.matmul %43, %4, %cst_23 {dimension_numbers = #tpu.dot_dimension_numbers<[1], [0], [0], [1], [0, 0, 1, 1], [], []>} : vector<8x128xbf16>, vector<128x128xbf16>, vector<8x128xf32> -> vector<8x128xf32>
    %48 = vector.broadcast %1 : vector<1x128xf32> to vector<8x128xf32>
    %49 = arith.addf %47, %48 : vector<8x128xf32>
    %cst_24 = arith.constant 0.000000e+00 : f32
    %50 = vector.broadcast %cst_24 : f32 to vector<8x128xf32>
    %51 = arith.subf %50, %46 : vector<8x128xf32>
    %52 = math.exp %51 : vector<8x128xf32>
    %cst_25 = arith.constant 1.000000e+00 : f32
    %53 = vector.broadcast %cst_25 : f32 to vector<8x128xf32>
    %54 = arith.addf %53, %52 : vector<8x128xf32>
    %55 = tpu.reciprocal %54 {approx = true} : vector<8x128xf32> -> vector<8x128xf32>
    %56 = arith.mulf %55, %49 : vector<8x128xf32>
    %57 = arith.truncf %56 : vector<8x128xf32> to vector<8x128xbf16>
    %cst_26 = arith.constant dense<0.000000e+00> : vector<8x128xf32>
    %58 = tpu.matmul %57, %5, %cst_26 {dimension_numbers = #tpu.dot_dimension_numbers<[1], [0], [0], [1], [0, 0, 1, 1], [], []>} : vector<8x128xbf16>, vector<128x128xbf16>, vector<8x128xf32> -> vector<8x128xf32>
    %59 = vector.broadcast %2 : vector<1x128xf32> to vector<8x128xf32>
    %60 = arith.addf %58, %59 : vector<8x128xf32>
    %c0_27 = arith.constant 0 : index
    %c0_28 = arith.constant 0 : index
    %61 = vector.load %arg7[%c0_27, %c0_28] : memref<8x128xf32, #tpu.memory_space<vmem>>, vector<8x128xf32>
    tpu.vector_store %arg7[%c0_27, %c0_28], %60 {strides = array<i32>} : memref<8x128xf32, #tpu.memory_space<vmem>>, vector<8x128xf32>,
    return
  }
  func.func @transform_0(%arg0: i32) -> (i32, i32) {
    %c0_i32 = arith.constant 0 : i32
    %c0_i32_0 = arith.constant 0 : i32
    return %arg0, %c0_i32 : i32, i32
  }
  func.func @transform_1(%arg0: i32) -> (i32, i32) {
    %c0_i32 = arith.constant 0 : i32
    %c0_i32_0 = arith.constant 0 : i32
    return %arg0, %c0_i32 : i32, i32
  }
  func.func @transform_2(%arg0: i32) -> (i32, i32) {
    %c0_i32 = arith.constant 0 : i32
    %c0_i32_0 = arith.constant 0 : i32
    %c0_i32_1 = arith.constant 0 : i32
    return %c0_i32, %c0_i32_0 : i32, i32
  }
  func.func @transform_3(%arg0: i32) -> (i32, i32) {
    %c0_i32 = arith.constant 0 : i32
    %c0_i32_0 = arith.constant 0 : i32
    %c0_i32_1 = arith.constant 0 : i32
    return %c0_i32, %c0_i32_0 : i32, i32
  }
  func.func @transform_4(%arg0: i32) -> (i32, i32) {
    %c0_i32 = arith.constant 0 : i32
    %c0_i32_0 = arith.constant 0 : i32
    %c0_i32_1 = arith.constant 0 : i32
    return %c0_i32, %c0_i32_0 : i32, i32
  }
  func.func @transform_5(%arg0: i32) -> (i32, i32) {
    %c0_i32 = arith.constant 0 : i32
    %c0_i32_0 = arith.constant 0 : i32
    %c0_i32_1 = arith.constant 0 : i32
    return %c0_i32, %c0_i32_0 : i32, i32
  }
  func.func @transform_6(%arg0: i32) -> (i32, i32) {
    %c0_i32 = arith.constant 0 : i32
    %c0_i32_0 = arith.constant 0 : i32
    return %arg0, %c0_i32 : i32, i32
  }
}

</mosaic_0001>

<bundles_post_ra>
// kernel: tpu_custom_call.1
= control target key start
LH: loop header
LB: loop body
LE: loop exit
PB: predicated region body
PF: predicated region fallthrough
CT: control target
= control target key end

     0   :  { %s1578_s0 = inlined_call_operand.hbm [shape: bf16[16,128], index: 0, kind: input, shape index: {}]   ;;  %s1579_s1 = inlined_call_operand.hbm [shape: bf16[16,128], index: 1, kind: input, shape index: {}]   ;;  %s1580_s2 = inlined_call_operand.hbm [shape: f32[3,128], index: 2, kind: input, shape index: {}]   ;;  %s1581_s3 = inlined_call_operand.hbm [shape: bf16[128,128], index: 3, kind: input, shape index: {}]   ;;  %s1582_s4 = inlined_call_operand.hbm [shape: bf16[128,128], index: 4, kind: input, shape index: {}]   ;;  %s1583_s5 = inlined_call_operand.hbm [shape: bf16[128,128], index: 5, kind: input, shape index: {}]   ;;  %s1584_s6 = inlined_call_operand.hbm [shape: f32[16,128], index: 6, kind: output, shape index: {}]  }
   0x1   :  { %1585 = sst [smem:[#allocation21_spill]] %s1580_s2 }
   0x2   :  { %1586 = sst [smem:[#allocation22_spill]] %s1581_s3 }
   0x3   :  { %1587 = sst [smem:[#allocation23_spill]] %s1582_s4 }
   0x4   :  { %1588 = sst [smem:[#allocation24_spill]] %s1583_s5 }
   0x5   :  { %11 = vsyncpa [#allocation3], 0 }
   0x6   :  { %13 = vsyncpa [#allocation3 + $0x1], 0 }
   0x7   :  { %14 = vsyncpa [#allocation6], 0 }
   0x8   :  { %16 = vsyncpa [#allocation6 + $0x1], 0 }
   0x9   :  { %17 = vsyncpa [#allocation9], 0 }
   0xa   :  { %18 = vsyncpa [#allocation12], 0 }
   0xb   :  { %19 = vsyncpa [#allocation4], 0 }
   0xc   :  { %21 = vsyncpa [#allocation4 + $0x1], 0  ;;  %s1374_s21 = smov 0   ;;  %s1376_s22 = smov 0  }
   0xd   :  { %s1378_s23 = smov 0   ;;  %s1380_s24 = smov 0  }
   0xe LB: > { %s1589_s2 = sld [smem:[#allocation21_spill]]  ;;  %s1398_s28 = sadd.s32 4294967295, %s1330_s24   ;;  %s1330_s24 = sphi %s1380_s24, %s1606_s24   ;;  %s1326_s23 = sphi %s1378_s23, %s1605_s23   ;;  %s1322_s22 = sphi %s1376_s22, %s1604_s22   ;;  %s1318_s21 = sphi %s1374_s21, %s1603_s21  }
   0xf   : > { %p818_p0 = scmp.ge.s32.totalorder %s1330_s24, 1  ;;  %p48_p1 = scmp.eq.s32.totalorder %s1398_s28, 0 }
  0x10   : > { %p194_p2 = scmp.lt.s32.totalorder %s1330_s24, 3  ;;  %s1332_s30 = smov [#allocation7]  }
  0x11   : > { %s208_s7 = sshll.u32 %s1332_s30, 4  ;;  %s1591_s3 = sld [smem:[#allocation22_spill]]  ;;  %s209_s7 = int_to_ptr.vmem [resolvable:$true] %s208_s7 }
  0x12   : > { %p1403_p3 = pnand %p818_p0, %p194_p2  ;;  %s1333_s12 = smov [#allocation8]  }
  0x13   : > { %s219_s13 = sshll.u32 %s1333_s12, 4  ;;  %s1334_s14 = smov 64   ;;  %s220_s13 = int_to_ptr.vmem [resolvable:$true] %s219_s13 }
  0x14   : > { %s206_s27 = sshll.u32 %s1589_s2, 4  ;;  %p982_p5 = pneg %p1403_p3  ;;  %s207_s27 = int_to_ptr.hbm [resolvable:$true] %s206_s27 }
  0x15   : > { %s1335_s15 = smov 4   ;;  %s1593_s4 = sld [smem:[#allocation23_spill]] }
  0x16   : > { %p1415_p6 = pnand %p982_p5, %p48_p1  ;;  %s1336_s19 = smov [#allocation10]  }
  0x17   : > { %s217_s10 = sshll.u32 %s1591_s3, 4  ;;  %s233_s20 = sshll.u32 %s1336_s19, 4  ;;  %s218_s10 = int_to_ptr.hbm [resolvable:$true] %s217_s10  ;;  %s234_s20 = int_to_ptr.vmem [resolvable:$true] %s233_s20 }
  0x18   : > { %985 = dma.hbm_to_vmem [thread:$0]  (!%p1415_p6), %s207_s27, 64, %s209_s7, [#allocation6]  }
  0x19   : > { %988 = dma.hbm_to_vmem [thread:$0]  (!%p1415_p6), %s218_s10, 1024, %s220_s13, [#allocation9], %s1334_s14, %s1334_s14, %s1335_s15  }
  0x1a   : > { %s1594_s5 = sld [smem:[#allocation24_spill]]  ;;  %s1337_s30 = smov [#allocation11]  }
  0x1b   : > { %s231_s18 = sshll.u32 %s1593_s4, 4  ;;  %s247_s7 = sshll.u32 %s1337_s30, 4  ;;  %s232_s18 = int_to_ptr.hbm [resolvable:$true] %s231_s18  ;;  %s248_s7 = int_to_ptr.vmem [resolvable:$true] %s247_s7 }
  0x1c   : > { %991 = dma.hbm_to_vmem [thread:$0]  (!%p1415_p6), %s232_s18, 1024, %s234_s20, [#allocation9], %s1334_s14, %s1334_s14, %s1335_s15  }
  0x1d   : > { %s817_s8 = sadd.s32 4294967294, %s1330_s24   ;;  %s1435_s9 = sadd.s32 1, %s1330_s24  }
  0x1e   : > { %s31_s10 = ssub.s32 %s1330_s24, %s1435_s9  ;;  %s34_s12 = sadd.s32 1, %s1326_s23 }
  0x1f   : > { %p32_p7 = scmp.eq.s32.totalorder %s31_s10, 0  ;;  %p41_p8 = scmp.ne.s32.totalorder %s1326_s23, %s1322_s22 }
  0x20   : > { %s245_s27 = sshll.u32 %s1594_s5, 4  ;;  %p42_p9 = scmp.eq.s32.totalorder %s1330_s24, 0  ;;  %s246_s27 = int_to_ptr.hbm [resolvable:$true] %s245_s27 }
  0x21   : > { %994 = dma.hbm_to_vmem [thread:$0]  (!%p1415_p6), %s246_s27, 1024, %s248_s7, [#allocation12], %s1334_s14, %s1334_s14, %s1335_s15  }
  0x22   : > { %p47_p10 = scmp.ne.s32.totalorder %s1322_s22, %s1318_s21  ;;  %p1448_p11 = por %p42_p9, %p41_p8 }
  0x23   : > { %s1446_s13 = scalar_select %p32_p7, %s1326_s23, %s34_s12  }
  0x24   : > { %p1454_p12 = por %p48_p1, %p47_p10  ;;  %p181_p13 = scmp.eq.s32.totalorder %s1398_s28, 1 }
  0x25   : > { %1595 = sst [smem:[#allocation20_spill]] %s1446_s13  ;;  %p187_p0 = scmp.eq.s32.totalorder %s817_s8, 1 }
  0x26   : > { %p1010_p2 = scmp.lt.s32.totalorder %s1330_s24, 2  ;;  %s261_s14 = sand.u32 1, %s1326_s23  }
  0x27   : > { %p1461_p5 = por %p181_p13, %p41_p8  ;;  %p1465_p6 = por %p187_p0, %p47_p10 }
  0x28   : > { %s1469_s18 = sshll.u32 %s261_s14, 2  ;;  %s825_s19 = sshll.u32 %s1330_s24, 2 }
  0x29   : > { %s269_s26 = scalar_lea.hbm %s1578_s0, %s825_s19  ;;  %s265_s27 = scalar_lea.vmem [#allocation2], %s1469_s18 }
  0x2a   : > { %s273_s30 = sshll.u32 %s265_s27, 4  ;;  %s271_s7 = sshll.u32 %s269_s26, 4  ;;  %s274_s30 = int_to_ptr.vmem [resolvable:$true] %s273_s30  ;;  %s272_s7 = int_to_ptr.hbm [resolvable:$true] %s271_s7 }
  0x2b   : > { %p1478_p7 = pnand %p1010_p2, %p1448_p11  ;;  %s288_s2 = scalar_lea.hbm %s1579_s1, %s825_s19 }
  0x2c   : > { %s280_s3 = sand.u32 1, %s1330_s24   ;;  %s262_s4 = scalar_lea.sflag [#allocation3], %s261_s14 }
  0x2d   : > { %s1188_s20 = sshra.s32 %s272_s7, 4  ;;  %p1192_p9 = pneg %p1478_p7  ;;  %s1189_s20 = int_to_ptr.hbm [resolvable:$true] %s1188_s20 }
  0x2e   : > { %s1190_s25 = scalar_lea.hbm %s1189_s20, 4  ;;  %s1195_s27 = scalar_lea.hbm %s1578_s0, 8 }
  0x2f   : > { %p1191_p8 = scmp.ne.s32.totalorder %s1189_s20, %s1190_s25  ;;  %p1196_p13 = scmp.lt.s32.totalorder %s1189_s20, %s1578_s0 }
  0x30   : > { %p1197_p0 = scmp.lt.s32.totalorder %s1195_s27, %s1190_s25 }
  0x31   : > { %p1193_p10 = pnand %p1192_p9, %p1191_p8 }
  0x32   : > { %p1198_p2 = por %p1197_p0, %p1196_p13 }
  0x33   : > { %p1194_p11 = pneg %p1193_p10 }
  0x35   : > { %p1199_p4 = pnand %p1198_p2, %p1194_p11 }
  0x37   : > { %1202 = shalt.err (!%p1199_p4)
}
  0x38   : > { %998 = dma.hbm_to_vmem [thread:$0]  (!%p1478_p7), %s272_s7, 64, %s274_s30, %s262_s4  }
  0x39   : > { %s290_s14 = sshll.u32 %s288_s2, 4  ;;  %s284_s19 = scalar_lea.vmem [#allocation5], %s1469_s18  ;;  %s291_s14 = int_to_ptr.hbm [resolvable:$true] %s290_s14 }
  0x3a   : > { %s292_s5 = sshll.u32 %s284_s19, 4  ;;  %s281_s16 = scalar_lea.sflag [#allocation6], %s280_s3  ;;  %s293_s5 = int_to_ptr.vmem [resolvable:$true] %s292_s5 }
  0x3b   : > { %s1218_s26 = sshra.s32 %s291_s14, 4  ;;  %s1225_s27 = scalar_lea.hbm %s1579_s1, 8  ;;  %s1219_s26 = int_to_ptr.hbm [resolvable:$true] %s1218_s26 }
  0x3c   : > { %s1220_s13 = scalar_lea.hbm %s1219_s26, 4  ;;  %p1226_p4 = scmp.lt.s32.totalorder %s1219_s26, %s1579_s1 }
  0x3d   : > { %p1221_p8 = scmp.ne.s32.totalorder %s1219_s26, %s1220_s13  ;;  %p1227_p13 = scmp.lt.s32.totalorder %s1225_s27, %s1220_s13 }
  0x3f   : > { %p1223_p10 = pnand %p1221_p8, %p1192_p9  ;;  %p1228_p0 = por %p1227_p13, %p1226_p4 }
  0x41   : > { %p1224_p11 = pneg %p1223_p10 }
  0x43   : > { %p1229_p2 = pnand %p1228_p0, %p1224_p11 }
  0x45   : > { %1232 = shalt.err (!%p1229_p2)
}
  0x46   : > { %1001 = dma.hbm_to_vmem [thread:$0]  (!%p1478_p7), %s291_s14, 64, %s293_s5, %s281_s16  }
  0x47   : > { %301 = sbr.rel (%p1403_p3) target bundleno = 645 (0x285), region = 44  ;;  %s1514_s2 = sand.u32 (!%p1403_p3), 1, %s1322_s22  }
  0x48   : > { %s829_s3 = sshll.u32 (!%p1403_p3), %s1514_s2, 2  ;;  %s304_s18 = scalar_lea.sflag (!%p1403_p3), [#allocation3], %s1514_s2 }
  0x49   : > { %s307_s30 = scalar_lea.vmem (!%p1403_p3), [#allocation2], %s829_s3 }
  0x4c   : > { %1293 = dma.done.wait (%p1454_p12), %s304_s18, 64  }
  0x4d   : > { %1295 = vsyncadd (%p1454_p12), %s304_s18, 4294967232  ;;  %s313_s5 = sand.u32 1, %s1398_s28   ;;  %s317_s29 = scalar_lea.vmem [#allocation5], %s829_s3 }
  0x4e   : > { %s314_s13 = scalar_lea.sflag [#allocation6], %s313_s5 }
  0x4f   : > { %1297 = dma.done.wait (%p1454_p12), %s314_s13, 64  }
  0x50   : > { %1299 = vsyncadd (%p1454_p12), %s314_s13, 4294967232 }
  0x51   : > { %1301 = dma.done.wait (%p48_p1), [#allocation6], 64  }
  0x52   : > { %1303 = vsyncadd (%p48_p1), [#allocation6], 4294967232 }
  0x53   : > { %1305 = dma.done.wait (%p48_p1), [#allocation9], 2048  }
  0x54   : > { %1307 = vsyncadd (%p48_p1), [#allocation9], 4294965248 }
  0x55   : > { %1309 = dma.done.wait (%p48_p1), [#allocation12], 1024  }
  0x56   : > { %1311 = vsyncadd (%p48_p1), [#allocation12], 4294966272  ;;  %v423_v0 = vld [vmem:[%s307_s30] sm:$0xf]  ;;  %v425_v2 = vld [vmem:[%s317_s29] sm:$0xf] }
  0x57   : > { %v424_v1 = vunpack.c.l.bf16 %v423_v0  ;;  %v426_v3 = vunpack.c.l.bf16 %v425_v2  ;;  %v1338_v4 = vmov 128.0   ;;  %v943_v7 = vld [vmem:[#allocation8 + $0x38] sm:$0xff]  ;;  %v942_v20 = vld [vmem:[#allocation8 + $0x30] sm:$0xff]  ;;  %v941_v21 = vld [vmem:[#allocation8 + $0x28] sm:$0xff]  ;;  %s933_s11 = sshll.u32 %s1398_s28, 3  ;;  %s835_s7 = sshll.u32 %s1514_s2, 3 }
  0x58   : > { %1058 = vrcp.f32 %v1338_v4  ;;  %525 = vmatpush.bf16.msra.mxu0 %v943_v7  ;;  %v951_v22 = vld [vmem:[#allocation10 + $0x38] sm:$0xff]  ;;  %v940_v23 = vld [vmem:[#allocation8 + $0x20] sm:$0xff]  ;;  %v950_v24 = vld [vmem:[#allocation10 + $0x30] sm:$0xff]  ;;  %s681_s14 = scalar_lea.hbm %s1584_s6, %s933_s11  ;;  %s371_s19 = scalar_lea.vmem [#allocation13], %s835_s7 }
  0x59   : > { %427 = vadd.xlane.f32.xlu0 %v424_v1  ;;  %587 = vmatpush.bf16.msra.mxu1 %v951_v22  ;;  %v939_v25 = vld [vmem:[#allocation8 + $0x18] sm:$0xff]  ;;  %v949_v26 = vld [vmem:[#allocation10 + $0x28] sm:$0xff]  ;;  %v938_v27 = vld [vmem:[#allocation8 + $0x10] sm:$0xff]  ;;  %s683_s16 = sshll.u32 %s371_s19, 4  ;;  %s685_s26 = sshll.u32 %s681_s14, 4  ;;  %s684_s16 = int_to_ptr.vmem [resolvable:$true] %s683_s16  ;;  %s686_s26 = int_to_ptr.hbm [resolvable:$true] %s685_s26 }
  0x5a   : > { %v948_v28 = vld [vmem:[#allocation10 + $0x20] sm:$0xff]  ;;  %v937_v29 = vld [vmem:[#allocation8 + $0x8] sm:$0xff]  ;;  %v947_v30 = vld [vmem:[#allocation10 + $0x18] sm:$0xff]  ;;  %s671_s20 = scalar_lea.sflag [#allocation4], %s1514_s2  ;;  %s1262_s25 = sshra.s32 %s686_s26, 4  ;;  %s1263_s25 = int_to_ptr.hbm [resolvable:$true] %s1262_s25 }
  0x5b   : > { %v936_v31 = vld [vmem:[#allocation8] sm:$0xff]  ;;  %v946_v32 = vld [vmem:[#allocation10 + $0x10] sm:$0xff]  ;;  %v945_v33 = vld [vmem:[#allocation10 + $0x8] sm:$0xff]  ;;  %s1264_s27 = scalar_lea.hbm %s1263_s25, 8  ;;  %s1268_s4 = scalar_lea.hbm %s1584_s6, 16 }
  0x5c   : > { %526 = vmatpush.bf16.msra.mxu0 %v942_v20  ;;  %v944_v34 = vld [vmem:[#allocation10] sm:$0xff]  ;;  %v959_v38 = vld [vmem:[#allocation11 + $0x38] sm:$0xff]  ;;  %v958_v60 = vld [vmem:[#allocation11 + $0x30] sm:$0xff]  ;;  %p1265_p1 = scmp.ne.s32.totalorder %s1263_s25, %s1264_s27  ;;  %p1269_p7 = scmp.lt.s32.totalorder %s1263_s25, %s1584_s6 }
  0x5d   : > { %588 = vmatpush.bf16.msra.mxu1 %v950_v24  ;;  %656 = vmatpush.bf16.msra.mxu2 %v959_v38  ;;  %v957_v61 = vld [vmem:[#allocation11 + $0x28] sm:$0xff]  ;;  %v956_v62 = vld [vmem:[#allocation11 + $0x20] sm:$0xff]  ;;  %v955_v63 = vld [vmem:[#allocation11 + $0x18] sm:$0xff]  ;;  %p1270_p9 = scmp.lt.s32.totalorder %s1268_s4, %s1264_s27 }
  0x5e   : > { %v1059_v5 = vpop.eup %1058  ;;  %v954_v0 = vld [vmem:[#allocation11 + $0x10] sm:$0xff]  ;;  %v952_v2 = vld [vmem:[#allocation11] sm:$0xff]  ;;  %p1266_p3 = pnand %p1265_p1, %p1461_p5 }
  0x5f   : > { %v430_v6 = vmul.f32 128.0, %v1059_v5  ;;  %vm434_vm0 = vweird.f32 %v1059_v5  ;;  %p1271_p8 = por %p1270_p9, %p1269_p7 }
  0x60   : > { %527 = vmatpush.bf16.msra.mxu0 %v941_v21  ;;  %p1267_p12 = pneg %p1266_p3 }
  0x61   : > { %455 = vadd.xlane.f32.xlu0 %v426_v3  ;;  %v431_v8 = vsub.f32 1.0, %v430_v6  ;;  %589 = vmatpush.bf16.msra.mxu1 %v949_v26 }
  0x62   : > { %657 = vmatpush.bf16.msra.mxu2 %v958_v60  ;;  %p1272_p10 = pnand %p1271_p8, %p1267_p12 }
  0x63   : > { %v432_v9 = vmul.f32 %v1059_v5, %v431_v8 }
  0x64   : > { %528 = vmatpush.bf16.msra.mxu0 %v940_v23 }
  0x65   : > { %v433_v10 = vadd.f32 %v1059_v5, %v432_v9  ;;  %590 = vmatpush.bf16.msra.mxu1 %v948_v28 }
  0x66   : > { %658 = vmatpush.bf16.msra.mxu2 %v957_v61 }
  0x67   : > { %v435_v11 = vsel %vm434_vm0, %v1059_v5, %v433_v10 }
  0x68   : > { %529 = vmatpush.bf16.msra.mxu0 %v939_v25 }
  0x69   : > { %591 = vmatpush.bf16.msra.mxu1 %v947_v30 }
  0x6a   : > { %659 = vmatpush.bf16.msra.mxu2 %v956_v62 }
  0x6c   : > { %530 = vmatpush.bf16.msra.mxu0 %v938_v27 }
  0x6d   : > { %592 = vmatpush.bf16.msra.mxu1 %v946_v32 }
  0x6e   : > { %660 = vmatpush.bf16.msra.mxu2 %v955_v63 }
  0x70   : > { %531 = vmatpush.bf16.msra.mxu0 %v937_v29 }
  0x71   : > { %593 = vmatpush.bf16.msra.mxu1 %v945_v33 }
  0x72   : > { %661 = vmatpush.bf16.msra.mxu2 %v954_v0 }
  0x74   : > { %532 = vmatpush.bf16.msra.mxu0 %v936_v31 }
  0x75   : > { %594 = vmatpush.bf16.msra.mxu1 %v944_v34 }
  0xcc   : > { %v428_v12 = vpop.xlane.xlu0 %427 }
  0xcd   : > { %v436_v13 = vmul.f32 %v435_v11, %v428_v12 }
  0xcf   : > { %v437_v14 = vsub.f32 %v424_v1, %v436_v13  ;;  %v953_v1 = vld [vmem:[#allocation11 + $0x8] sm:$0xff]  ;;  %v1056_v13 = vld [vmem:[#allocation7 + $0x1] ss:$0 sm:$0xff] }
  0xd0   : > { %662 = vmatpush.bf16.msra.mxu2 %v953_v1 }
  0xd1   : > { %v438_v15 = vmul.f32 %v437_v14, %v437_v14 }
  0xd3   : > { %439 = vadd.xlane.f32.xlu1 %v438_v15 }
  0xd4   : > { %v456_v16 = vpop.xlane.xlu0 %455  ;;  %663 = vmatpush.bf16.msra.mxu2 %v952_v2 }
  0xd5   : > { %v457_v17 = vmul.f32 %v456_v16, %v435_v11 }
  0xd7   : > { %v1539_v18 = vsub.f32 %v426_v3, %v457_v17  ;;  %v1055_v3 = vld [vmem:[#allocation7] ss:$0 sm:$0xff] }
  0xd9   : > { %v459_v19 = vmul.f32 %v1539_v18, %v1539_v18 }
  0xdb   : > { %460 = vadd.xlane.f32.xlu1 %v459_v19 }
 0x146   : > { %v440_v35 = vpop.xlane.xlu1 %439 }
 0x147   : > { %v441_v36 = vmul.f32 %v440_v35, %v435_v11 }
 0x149   : > { %v442_v37 = vadd.f32 1e-06, %v441_v36 }
 0x14b   : > { %1060 = vrsqrt.f32 %v442_v37  ;;  %vm449_vm2 = vweird.f32 %v442_v37 }
 0x14e   : > { %v461_v39 = vpop.xlane.xlu1 %460 }
 0x14f   : > { %v462_v40 = vmul.f32 %v461_v39, %v435_v11 }
 0x151   : > { %v1061_v41 = vpop.eup %1060  ;;  %v463_v42 = vadd.f32 1e-06, %v462_v40 }
 0x152   : > { %v444_v43 = vmul.f32 %v1061_v41, %v442_v37  ;;  %vm450_vm1 = vweird.f32 %v1061_v41 }
 0x153   : > { %1062 = vrsqrt.f32 %v463_v42  ;;  %vm451_vm3 = vmor %vm449_vm2, %vm450_vm1  ;;  %vm470_vm4 = vweird.f32 %v463_v42 }
 0x154   : > { %v445_v44 = vmul.f32 %v1061_v41, %v444_v43 }
 0x156   : > { %v446_v45 = vmul.f32 0.5, %v445_v44 }
 0x158   : > { %v447_v46 = vsub.f32 1.5, %v446_v45 }
 0x159   : > { %v1063_v47 = vpop.eup %1062 }
 0x15a   : > { %v465_v48 = vmul.f32 %v1063_v47, %v463_v42  ;;  %v448_v49 = vmul.f32 %v1061_v41, %v447_v46  ;;  %vm471_vm5 = vweird.f32 %v1063_v47 }
 0x15b   : > { %vm472_vm6 = vmor %vm470_vm4, %vm471_vm5 }
 0x15c   : > { %v466_v50 = vmul.f32 %v1063_v47, %v465_v48  ;;  %v452_v51 = vsel %vm451_vm3, %v1061_v41, %v448_v49 }
 0x15d   : > { %v453_v52 = vmul.f32 %v452_v51, %v437_v14 }
 0x15e   : > { %v467_v53 = vmul.f32 0.5, %v466_v50 }
 0x15f   : > { %v454_v54 = vpack.c.bf16 %v453_v52, %v453_v52 }
 0x160   : > { %v468_v55 = vsub.f32 1.5, %v467_v53 }
 0x161   : > { %533 = vmatmul.bf16.vlgmr.msra.gmra.mxu0 %v454_v54 }
 0x162   : > { %v469_v56 = vmul.f32 %v1063_v47, %v468_v55 }
 0x164   : > { %v473_v57 = vsel %vm472_vm6, %v1063_v47, %v469_v56 }
 0x165   : > { %v474_v58 = vmul.f32 %v473_v57, %v1539_v18  ;;  %v1057_v18 = vld [vmem:[#allocation7 + $0x2] ss:$0 sm:$0xff] }
 0x167   : > { %v475_v59 = vpack.c.bf16 %v474_v58, %v474_v58 }
 0x169   : > { %595 = vmatmul.bf16.vlgmr.msra.gmra.mxu1 %v475_v59 }
 0x1de   : > { %v534_v4 = vpop.f32.mrf.mxu0 }
 0x1df   : > { %v535_v5 = vadd.f32 %v1055_v3, %v534_v4 }
 0x1e1   : > { %v600_v6 = vsub.f32 0.0, %v535_v5 }
 0x1e3   : > { %v601_v7 = vmul.f32 1.442695, %v600_v6 }
 0x1e5   : > { %1064 = vpow2.f32 %v601_v7 }
 0x1e6   : > { %v536_v8 = vpop.f32.mrf.mxu0  ;;  %v596_v9 = vpop.f32.mrf.mxu1 }
 0x1e7   : > { %v597_v14 = vadd.f32 %v1056_v13, %v596_v9 }
 0x1eb   : > { %v1065_v10 = vpop.eup %1064 }
 0x1ec   : > { %v603_v11 = vadd.f32 1.0, %v1065_v10 }
 0x1ee   : > { %1066 = vrcp.f32 %v603_v11  ;;  %v598_v12 = vpop.f32.mrf.mxu1 }
 0x1f4   : > { %v1067_v15 = vpop.eup %1066 }
 0x1f5   : > { %v605_v16 = vmul.f32 %v1067_v15, %v597_v14 }
 0x1f7   : > { %v606_v17 = vpack.c.bf16 %v605_v16, %v605_v16 }
 0x1f9   : > { %664 = vmatmul.bf16.vlgmr.msra.gmra.mxu2 %v606_v17 }
 0x27c   : > { %v665_v19 = vpop.f32.mrf.mxu2 }
 0x27d   : > { %v666_v20 = vadd.f32 %v1057_v18, %v665_v19 }
 0x27f   : > { %669 = vst [vmem:[%s371_s19] sm:$0xff] %v666_v20 }
 0x280   : > { %1275 = shalt.err (!%p1272_p10)
}
 0x281   : > { %980 = dma.vmem_to_hbm [thread:$0]  (%p1461_p5), %s684_s16, 128, %s686_s26, %s671_s20  }
 0x284   : > { %v667_v21 = vpop.f32.mrf.mxu2 }
 0x285 PF: > { %s697_s2 = sand.u32 1, %s1318_s21   ;;  %p1601_p11 = scmp.ge.s32.totalorder %s1330_s24, 2 }
 0x286   : > { %s698_s30 = scalar_lea.sflag [#allocation4], %s697_s2 }
 0x287   : > { %p1003_p4 = pnand %p1601_p11, %p1465_p6 }
 0x289   : > { %p1004_p13 = pneg %p1003_p4 }
 0x28b   : > { %1313 = dma.done.wait (%p1004_p13), %s698_s30, 128  }
 0x28c   : > { %1315 = vsyncadd (%p1004_p13), %s698_s30, 4294967168  ;;  %s1602_s5 = sld [smem:[#allocation20_spill]]  ;;  %p24_p0 = scmp.ge.s32.totalorder %s1435_s9, 4  }
 0x28d   : > { %s1603_s21 = smov %s1322_s22  ;;  %s1604_s22 = smov %s1326_s23 }
 0x28e   : > { %s1606_s24 = smov %s1435_s9  ;;  %26 = sbr.rel (!%p24_p0) target bundleno = 14 (0xe), region = 118 }
 0x292   : > { %s1605_s23 = smov %s1602_s5 }
 0x293   :  { %704 = vsyncpa [#allocation3], 1 }
 0x294   :  { %706 = vsyncpa [#allocation3 + $0x1], 1 }
 0x295   :  { %707 = vsyncpa [#allocation6], 1 }
 0x296   :  { %709 = vsyncpa [#allocation6 + $0x1], 1 }
 0x297   :  { %710 = vsyncpa [#allocation9], 1 }
 0x298   :  { %711 = vsyncpa [#allocation12], 1 }
 0x299   :  { %712 = vsyncpa [#allocation4], 1 }
 0x29a   :  { %714 = vsyncpa [#allocation4 + $0x1], 1 }

// kernel: tpu_custom_call.1
= control target key start
LH: loop header
LB: loop body
LE: loop exit
PB: predicated region body
PF: predicated region fallthrough
CT: control target
= control target key end

     0   :  { %s1578_s0 = inlined_call_operand.hbm [shape: bf16[16,128], index: 0, kind: input, shape index: {}]   ;;  %s1579_s1 = inlined_call_operand.hbm [shape: bf16[16,128], index: 1, kind: input, shape index: {}]   ;;  %s1580_s2 = inlined_call_operand.hbm [shape: f32[3,128], index: 2, kind: input, shape index: {}]   ;;  %s1581_s3 = inlined_call_operand.hbm [shape: bf16[128,128], index: 3, kind: input, shape index: {}]   ;;  %s1582_s4 = inlined_call_operand.hbm [shape: bf16[128,128], index: 4, kind: input, shape index: {}]   ;;  %s1583_s5 = inlined_call_operand.hbm [shape: bf16[128,128], index: 5, kind: input, shape index: {}]   ;;  %s1584_s6 = inlined_call_operand.hbm [shape: f32[16,128], index: 6, kind: output, shape index: {}]  }
   0x1   :  { %1585 = sst [smem:[#allocation21_spill]] %s1580_s2 }
   0x2   :  { %1586 = sst [smem:[#allocation22_spill]] %s1581_s3 }
   0x3   :  { %1587 = sst [smem:[#allocation23_spill]] %s1582_s4 }
   0x4   :  { %1588 = sst [smem:[#allocation24_spill]] %s1583_s5 }
   0x5   :  { %11 = vsyncpa [#allocation3], 0 }
   0x6   :  { %13 = vsyncpa [#allocation3 + $0x1], 0 }
   0x7   :  { %14 = vsyncpa [#allocation6], 0 }
   0x8   :  { %16 = vsyncpa [#allocation6 + $0x1], 0 }
   0x9   :  { %17 = vsyncpa [#allocation9], 0 }
   0xa   :  { %18 = vsyncpa [#allocation12], 0 }
   0xb   :  { %19 = vsyncpa [#allocation4], 0 }
   0xc   :  { %21 = vsyncpa [#allocation4 + $0x1], 0  ;;  %s1374_s21 = smov 0   ;;  %s1376_s22 = smov 0  }
   0xd   :  { %s1378_s23 = smov 0   ;;  %s1380_s24 = smov 0  }
   0xe LB: > { %s1589_s2 = sld [smem:[#allocation21_spill]]  ;;  %s1398_s28 = sadd.s32 4294967295, %s1330_s24   ;;  %s1330_s24 = sphi %s1380_s24, %s1606_s24   ;;  %s1326_s23 = sphi %s1378_s23, %s1605_s23   ;;  %s1322_s22 = sphi %s1376_s22, %s1604_s22   ;;  %s1318_s21 = sphi %s1374_s21, %s1603_s21  }
   0xf   : > { %p818_p0 = scmp.ge.s32.totalorder %s1330_s24, 1  ;;  %p48_p1 = scmp.eq.s32.totalorder %s1398_s28, 0 }
  0x10   : > { %p194_p2 = scmp.lt.s32.totalorder %s1330_s24, 3  ;;  %s1332_s30 = smov [#allocation7]  }
  0x11   : > { %s208_s7 = sshll.u32 %s1332_s30, 4  ;;  %s1591_s3 = sld [smem:[#allocation22_spill]]  ;;  %s209_s7 = int_to_ptr.vmem [resolvable:$true] %s208_s7 }
  0x12   : > { %p1403_p3 = pnand %p818_p0, %p194_p2  ;;  %s1333_s12 = smov [#allocation8]  }
  0x13   : > { %s219_s13 = sshll.u32 %s1333_s12, 4  ;;  %s1334_s14 = smov 64   ;;  %s220_s13 = int_to_ptr.vmem [resolvable:$true] %s219_s13 }
  0x14   : > { %s206_s27 = sshll.u32 %s1589_s2, 4  ;;  %p982_p5 = pneg %p1403_p3  ;;  %s207_s27 = int_to_ptr.hbm [resolvable:$true] %s206_s27 }
  0x15   : > { %s1335_s15 = smov 4   ;;  %s1593_s4 = sld [smem:[#allocation23_spill]] }
  0x16   : > { %p1415_p6 = pnand %p982_p5, %p48_p1  ;;  %s1336_s19 = smov [#allocation10]  }
  0x17   : > { %s217_s10 = sshll.u32 %s1591_s3, 4  ;;  %s233_s20 = sshll.u32 %s1336_s19, 4  ;;  %s218_s10 = int_to_ptr.hbm [resolvable:$true] %s217_s10  ;;  %s234_s20 = int_to_ptr.vmem [resolvable:$true] %s233_s20 }
  0x18   : > { %985 = dma.hbm_to_vmem [thread:$0]  (!%p1415_p6), %s207_s27, 64, %s209_s7, [#allocation6]  }
  0x19   : > { %988 = dma.hbm_to_vmem [thread:$0]  (!%p1415_p6), %s218_s10, 1024, %s220_s13, [#allocation9], %s1334_s14, %s1334_s14, %s1335_s15  }
  0x1a   : > { %s1594_s5 = sld [smem:[#allocation24_spill]]  ;;  %s1337_s30 = smov [#allocation11]  }
  0x1b   : > { %s231_s18 = sshll.u32 %s1593_s4, 4  ;;  %s247_s7 = sshll.u32 %s1337_s30, 4  ;;  %s232_s18 = int_to_ptr.hbm [resolvable:$true] %s231_s18  ;;  %s248_s7 = int_to_ptr.vmem [resolvable:$true] %s247_s7 }
  0x1c   : > { %991 = dma.hbm_to_vmem [thread:$0]  (!%p1415_p6), %s232_s18, 1024, %s234_s20, [#allocation9], %s1334_s14, %s1334_s14, %s1335_s15  }
  0x1d   : > { %s817_s8 = sadd.s32 4294967294, %s1330_s24   ;;  %s1435_s9 = sadd.s32 1, %s1330_s24  }
  0x1e   : > { %s31_s10 = ssub.s32 %s1330_s24, %s1435_s9  ;;  %s34_s12 = sadd.s32 1, %s1326_s23 }
  0x1f   : > { %p32_p7 = scmp.eq.s32.totalorder %s31_s10, 0  ;;  %p41_p8 = scmp.ne.s32.totalorder %s1326_s23, %s1322_s22 }
  0x20   : > { %s245_s27 = sshll.u32 %s1594_s5, 4  ;;  %p42_p9 = scmp.eq.s32.totalorder %s1330_s24, 0  ;;  %s246_s27 = int_to_ptr.hbm [resolvable:$true] %s245_s27 }
  0x21   : > { %994 = dma.hbm_to_vmem [thread:$0]  (!%p1415_p6), %s246_s27, 1024, %s248_s7, [#allocation12], %s1334_s14, %s1334_s14, %s1335_s15  }
  0x22   : > { %p47_p10 = scmp.ne.s32.totalorder %s1322_s22, %s1318_s21  ;;  %p1448_p11 = por %p42_p9, %p41_p8 }
  0x23   : > { %s1446_s13 = scalar_select %p32_p7, %s1326_s23, %s34_s12  }
  0x24   : > { %p1454_p12 = por %p48_p1, %p47_p10  ;;  %p181_p13 = scmp.eq.s32.totalorder %s1398_s28, 1 }
  0x25   : > { %1595 = sst [smem:[#allocation20_spill]] %s1446_s13  ;;  %p187_p0 = scmp.eq.s32.totalorder %s817_s8, 1 }
  0x26   : > { %p1010_p2 = scmp.lt.s32.totalorder %s1330_s24, 2  ;;  %s261_s14 = sand.u32 1, %s1326_s23  }
  0x27   : > { %p1461_p5 = por %p181_p13, %p41_p8  ;;  %p1465_p6 = por %p187_p0, %p47_p10 }
  0x28   : > { %s1469_s18 = sshll.u32 %s261_s14, 2  ;;  %s825_s19 = sshll.u32 %s1330_s24, 2 }
  0x29   : > { %s269_s26 = scalar_lea.hbm %s1578_s0, %s825_s19  ;;  %s265_s27 = scalar_lea.vmem [#allocation2], %s1469_s18 }
  0x2a   : > { %s273_s30 = sshll.u32 %s265_s27, 4  ;;  %s271_s7 = sshll.u32 %s269_s26, 4  ;;  %s274_s30 = int_to_ptr.vmem [resolvable:$true] %s273_s30  ;;  %s272_s7 = int_to_ptr.hbm [resolvable:$true] %s271_s7 }
  0x2b   : > { %p1478_p7 = pnand %p1010_p2, %p1448_p11  ;;  %s288_s2 = scalar_lea.hbm %s1579_s1, %s825_s19 }
  0x2c   : > { %s280_s3 = sand.u32 1, %s1330_s24   ;;  %s262_s4 = scalar_lea.sflag [#allocation3], %s261_s14 }
  0x2d   : > { %s1188_s20 = sshra.s32 %s272_s7, 4  ;;  %p1192_p9 = pneg %p1478_p7  ;;  %s1189_s20 = int_to_ptr.hbm [resolvable:$true] %s1188_s20 }
  0x2e   : > { %s1190_s25 = scalar_lea.hbm %s1189_s20, 4  ;;  %s1195_s27 = scalar_lea.hbm %s1578_s0, 8 }
  0x2f   : > { %p1191_p8 = scmp.ne.s32.totalorder %s1189_s20, %s1190_s25  ;;  %p1196_p13 = scmp.lt.s32.totalorder %s1189_s20, %s1578_s0 }
  0x30   : > { %p1197_p0 = scmp.lt.s32.totalorder %s1195_s27, %s1190_s25 }
  0x31   : > { %p1193_p10 = pnand %p1192_p9, %p1191_p8 }
  0x32   : > { %p1198_p2 = por %p1197_p0, %p1196_p13 }
  0x33   : > { %p1194_p11 = pneg %p1193_p10 }
  0x35   : > { %p1199_p4 = pnand %p1198_p2, %p1194_p11 }
  0x37   : > { %1202 = shalt.err (!%p1199_p4)
}
  0x38   : > { %998 = dma.hbm_to_vmem [thread:$0]  (!%p1478_p7), %s272_s7, 64, %s274_s30, %s262_s4  }
  0x39   : > { %s290_s14 = sshll.u32 %s288_s2, 4  ;;  %s284_s19 = scalar_lea.vmem [#allocation5], %s1469_s18  ;;  %s291_s14 = int_to_ptr.hbm [resolvable:$true] %s290_s14 }
  0x3a   : > { %s292_s5 = sshll.u32 %s284_s19, 4  ;;  %s281_s16 = scalar_lea.sflag [#allocation6], %s280_s3  ;;  %s293_s5 = int_to_ptr.vmem [resolvable:$true] %s292_s5 }
  0x3b   : > { %s1218_s26 = sshra.s32 %s291_s14, 4  ;;  %s1225_s27 = scalar_lea.hbm %s1579_s1, 8  ;;  %s1219_s26 = int_to_ptr.hbm [resolvable:$true] %s1218_s26 }
  0x3c   : > { %s1220_s13 = scalar_lea.hbm %s1219_s26, 4  ;;  %p1226_p4 = scmp.lt.s32.totalorder %s1219_s26, %s1579_s1 }
  0x3d   : > { %p1221_p8 = scmp.ne.s32.totalorder %s1219_s26, %s1220_s13  ;;  %p1227_p13 = scmp.lt.s32.totalorder %s1225_s27, %s1220_s13 }
  0x3f   : > { %p1223_p10 = pnand %p1221_p8, %p1192_p9  ;;  %p1228_p0 = por %p1227_p13, %p1226_p4 }
  0x41   : > { %p1224_p11 = pneg %p1223_p10 }
  0x43   : > { %p1229_p2 = pnand %p1228_p0, %p1224_p11 }
  0x45   : > { %1232 = shalt.err (!%p1229_p2)
}
  0x46   : > { %1001 = dma.hbm_to_vmem [thread:$0]  (!%p1478_p7), %s291_s14, 64, %s293_s5, %s281_s16  }
  0x47   : > { %301 = sbr.rel (%p1403_p3) target bundleno = 645 (0x285), region = 44  ;;  %s1514_s2 = sand.u32 (!%p1403_p3), 1, %s1322_s22  }
  0x48   : > { %s829_s3 = sshll.u32 (!%p1403_p3), %s1514_s2, 2  ;;  %s304_s18 = scalar_lea.sflag (!%p1403_p3), [#allocation3], %s1514_s2 }
  0x49   : > { %s307_s30 = scalar_lea.vmem (!%p1403_p3), [#allocation2], %s829_s3 }
  0x4c   : > { %1293 = dma.done.wait (%p1454_p12), %s304_s18, 64  }
  0x4d   : > { %1295 = vsyncadd (%p1454_p12), %s304_s18, 4294967232  ;;  %s313_s5 = sand.u32 1, %s1398_s28   ;;  %s317_s29 = scalar_lea.vmem [#allocation5], %s829_s3 }
  0x4e   : > { %s314_s13 = scalar_lea.sflag [#allocation6], %s313_s5 }
  0x4f   : > { %1297 = dma.done.wait (%p1454_p12), %s314_s13, 64  }
  0x50   : > { %1299 = vsyncadd (%p1454_p12), %s314_s13, 4294967232 }
  0x51   : > { %1301 = dma.done.wait (%p48_p1), [#allocation6], 64  }
  0x52   : > { %1303 = vsyncadd (%p48_p1), [#allocation6], 4294967232 }
  0x53   : > { %1305 = dma.done.wait (%p48_p1), [#allocation9], 2048  }
  0x54   : > { %1307 = vsyncadd (%p48_p1), [#allocation9], 4294965248 }
  0x55   : > { %1309 = dma.done.wait (%p48_p1), [#allocation12], 1024  }
  0x56   : > { %1311 = vsyncadd (%p48_p1), [#allocation12], 4294966272  ;;  %v423_v0 = vld [vmem:[%s307_s30] sm:$0xf]  ;;  %v425_v2 = vld [vmem:[%s317_s29] sm:$0xf] }
  0x57   : > { %v424_v1 = vunpack.c.l.bf16 %v423_v0  ;;  %v426_v3 = vunpack.c.l.bf16 %v425_v2  ;;  %v1338_v4 = vmov 128.0   ;;  %v943_v7 = vld [vmem:[#allocation8 + $0x38] sm:$0xff]  ;;  %v942_v20 = vld [vmem:[#allocation8 + $0x30] sm:$0xff]  ;;  %v941_v21 = vld [vmem:[#allocation8 + $0x28] sm:$0xff]  ;;  %s933_s11 = sshll.u32 %s1398_s28, 3  ;;  %s835_s7 = sshll.u32 %s1514_s2, 3 }
  0x58   : > { %1058 = vrcp.f32 %v1338_v4  ;;  %525 = vmatpush.bf16.msra.mxu0 %v943_v7  ;;  %v951_v22 = vld [vmem:[#allocation10 + $0x38] sm:$0xff]  ;;  %v940_v23 = vld [vmem:[#allocation8 + $0x20] sm:$0xff]  ;;  %v950_v24 = vld [vmem:[#allocation10 + $0x30] sm:$0xff]  ;;  %s681_s14 = scalar_lea.hbm %s1584_s6, %s933_s11  ;;  %s371_s19 = scalar_lea.vmem [#allocation13], %s835_s7 }
  0x59   : > { %427 = vadd.xlane.f32.xlu0 %v424_v1  ;;  %587 = vmatpush.bf16.msra.mxu1 %v951_v22  ;;  %v939_v25 = vld [vmem:[#allocation8 + $0x18] sm:$0xff]  ;;  %v949_v26 = vld [vmem:[#allocation10 + $0x28] sm:$0xff]  ;;  %v938_v27 = vld [vmem:[#allocation8 + $0x10] sm:$0xff]  ;;  %s683_s16 = sshll.u32 %s371_s19, 4  ;;  %s685_s26 = sshll.u32 %s681_s14, 4  ;;  %s684_s16 = int_to_ptr.vmem [resolvable:$true] %s683_s16  ;;  %s686_s26 = int_to_ptr.hbm [resolvable:$true] %s685_s26 }
  0x5a   : > { %v948_v28 = vld [vmem:[#allocation10 + $0x20] sm:$0xff]  ;;  %v937_v29 = vld [vmem:[#allocation8 + $0x8] sm:$0xff]  ;;  %v947_v30 = vld [vmem:[#allocation10 + $0x18] sm:$0xff]  ;;  %s671_s20 = scalar_lea.sflag [#allocation4], %s1514_s2  ;;  %s1262_s25 = sshra.s32 %s686_s26, 4  ;;  %s1263_s25 = int_to_ptr.hbm [resolvable:$true] %s1262_s25 }
  0x5b   : > { %v936_v31 = vld [vmem:[#allocation8] sm:$0xff]  ;;  %v946_v32 = vld [vmem:[#allocation10 + $0x10] sm:$0xff]  ;;  %v945_v33 = vld [vmem:[#allocation10 + $0x8] sm:$0xff]  ;;  %s1264_s27 = scalar_lea.hbm %s1263_s25, 8  ;;  %s1268_s4 = scalar_lea.hbm %s1584_s6, 16 }
  0x5c   : > { %526 = vmatpush.bf16.msra.mxu0 %v942_v20  ;;  %v944_v34 = vld [vmem:[#allocation10] sm:$0xff]  ;;  %v959_v38 = vld [vmem:[#allocation11 + $0x38] sm:$0xff]  ;;  %v958_v60 = vld [vmem:[#allocation11 + $0x30] sm:$0xff]  ;;  %p1265_p1 = scmp.ne.s32.totalorder %s1263_s25, %s1264_s27  ;;  %p1269_p7 = scmp.lt.s32.totalorder %s1263_s25, %s1584_s6 }
  0x5d   : > { %588 = vmatpush.bf16.msra.mxu1 %v950_v24  ;;  %656 = vmatpush.bf16.msra.mxu2 %v959_v38  ;;  %v957_v61 = vld [vmem:[#allocation11 + $0x28] sm:$0xff]  ;;  %v956_v62 = vld [vmem:[#allocation11 + $0x20] sm:$0xff]  ;;  %v955_v63 = vld [vmem:[#allocation11 + $0x18] sm:$0xff]  ;;  %p1270_p9 = scmp.lt.s32.totalorder %s1268_s4, %s1264_s27 }
  0x5e   : > { %v1059_v5 = vpop.eup %1058  ;;  %v954_v0 = vld [vmem:[#allocation11 + $0x10] sm:$0xff]  ;;  %v952_v2 = vld [vmem:[#allocation11] sm:$0xff]  ;;  %p1266_p3 = pnand %p1265_p1, %p1461_p5 }
  0x5f   : > { %v430_v6 = vmul.f32 128.0, %v1059_v5  ;;  %vm434_vm0 = vweird.f32 %v1059_v5  ;;  %p1271_p8 = por %p1270_p9, %p1269_p7 }
  0x60   : > { %527 = vmatpush.bf16.msra.mxu0 %v941_v21  ;;  %p1267_p12 = pneg %p1266_p3 }
  0x61   : > { %455 = vadd.xlane.f32.xlu0 %v426_v3  ;;  %v431_v8 = vsub.f32 1.0, %v430_v6  ;;  %589 = vmatpush.bf16.msra.mxu1 %v949_v26 }
  0x62   : > { %657 = vmatpush.bf16.msra.mxu2 %v958_v60  ;;  %p1272_p10 = pnand %p1271_p8, %p1267_p12 }
  0x63   : > { %v432_v9 = vmul.f32 %v1059_v5, %v431_v8 }
  0x64   : > { %528 = vmatpush.bf16.msra.mxu0 %v940_v23 }
  0x65   : > { %v433_v10 = vadd.f32 %v1059_v5, %v432_v9  ;;  %590 = vmatpush.bf16.msra.mxu1 %v948_v28 }
  0x66   : > { %658 = vmatpush.bf16.msra.mxu2 %v957_v61 }
  0x67   : > { %v435_v11 = vsel %vm434_vm0, %v1059_v5, %v433_v10 }
  0x68   : > { %529 = vmatpush.bf16.msra.mxu0 %v939_v25 }
  0x69   : > { %591 = vmatpush.bf16.msra.mxu1 %v947_v30 }
  0x6a   : > { %659 = vmatpush.bf16.msra.mxu2 %v956_v62 }
  0x6c   : > { %530 = vmatpush.bf16.msra.mxu0 %v938_v27 }
  0x6d   : > { %592 = vmatpush.bf16.msra.mxu1 %v946_v32 }
  0x6e   : > { %660 = vmatpush.bf16.msra.mxu2 %v955_v63 }
  0x70   : > { %531 = vmatpush.bf16.msra.mxu0 %v937_v29 }
  0x71   : > { %593 = vmatpush.bf16.msra.mxu1 %v945_v33 }
  0x72   : > { %661 = vmatpush.bf16.msra.mxu2 %v954_v0 }
  0x74   : > { %532 = vmatpush.bf16.msra.mxu0 %v936_v31 }
  0x75   : > { %594 = vmatpush.bf16.msra.mxu1 %v944_v34 }
  0xcc   : > { %v428_v12 = vpop.xlane.xlu0 %427 }
  0xcd   : > { %v436_v13 = vmul.f32 %v435_v11, %v428_v12 }
  0xcf   : > { %v437_v14 = vsub.f32 %v424_v1, %v436_v13  ;;  %v953_v1 = vld [vmem:[#allocation11 + $0x8] sm:$0xff]  ;;  %v1056_v13 = vld [vmem:[#allocation7 + $0x1] ss:$0 sm:$0xff] }
  0xd0   : > { %662 = vmatpush.bf16.msra.mxu2 %v953_v1 }
  0xd1   : > { %v438_v15 = vmul.f32 %v437_v14, %v437_v14 }
  0xd3   : > { %439 = vadd.xlane.f32.xlu1 %v438_v15 }
  0xd4   : > { %v456_v16 = vpop.xlane.xlu0 %455  ;;  %663 = vmatpush.bf16.msra.mxu2 %v952_v2 }
  0xd5   : > { %v457_v17 = vmul.f32 %v456_v16, %v435_v11 }
  0xd7   : > { %v1539_v18 = vsub.f32 %v426_v3, %v457_v17  ;;  %v1055_v3 = vld [vmem:[#allocation7] ss:$0 sm:$0xff] }
  0xd9   : > { %v459_v19 = vmul.f32 %v1539_v18, %v1539_v18 }
  0xdb   : > { %460 = vadd.xlane.f32.xlu1 %v459_v19 }
 0x146   : > { %v440_v35 = vpop.xlane.xlu1 %439 }
 0x147   : > { %v441_v36 = vmul.f32 %v440_v35, %v435_v11 }
 0x149   : > { %v442_v37 = vadd.f32 1e-06, %v441_v36 }
 0x14b   : > { %1060 = vrsqrt.f32 %v442_v37  ;;  %vm449_vm2 = vweird.f32 %v442_v37 }
 0x14e   : > { %v461_v39 = vpop.xlane.xlu1 %460 }
 0x14f   : > { %v462_v40 = vmul.f32 %v461_v39, %v435_v11 }
 0x151   : > { %v1061_v41 = vpop.eup %1060  ;;  %v463_v42 = vadd.f32 1e-06, %v462_v40 }
 0x152   : > { %v444_v43 = vmul.f32 %v1061_v41, %v442_v37  ;;  %vm450_vm1 = vweird.f32 %v1061_v41 }
 0x153   : > { %1062 = vrsqrt.f32 %v463_v42  ;;  %vm451_vm3 = vmor %vm449_vm2, %vm450_vm1  ;;  %vm470_vm4 = vweird.f32 %v463_v42 }
 0x154   : > { %v445_v44 = vmul.f32 %v1061_v41, %v444_v43 }
 0x156   : > { %v446_v45 = vmul.f32 0.5, %v445_v44 }
 0x158   : > { %v447_v46 = vsub.f32 1.5, %v446_v45 }
 0x159   : > { %v1063_v47 = vpop.eup %1062 }
 0x15a   : > { %v465_v48 = vmul.f32 %v1063_v47, %v463_v42  ;;  %v448_v49 = vmul.f32 %v1061_v41, %v447_v46  ;;  %vm471_vm5 = vweird.f32 %v1063_v47 }
 0x15b   : > { %vm472_vm6 = vmor %vm470_vm4, %vm471_vm5 }
 0x15c   : > { %v466_v50 = vmul.f32 %v1063_v47, %v465_v48  ;;  %v452_v51 = vsel %vm451_vm3, %v1061_v41, %v448_v49 }
 0x15d   : > { %v453_v52 = vmul.f32 %v452_v51, %v437_v14 }
 0x15e   : > { %v467_v53 = vmul.f32 0.5, %v466_v50 }
 0x15f   : > { %v454_v54 = vpack.c.bf16 %v453_v52, %v453_v52 }
 0x160   : > { %v468_v55 = vsub.f32 1.5, %v467_v53 }
 0x161   : > { %533 = vmatmul.bf16.vlgmr.msra.gmra.mxu0 %v454_v54 }
 0x162   : > { %v469_v56 = vmul.f32 %v1063_v47, %v468_v55 }
 0x164   : > { %v473_v57 = vsel %vm472_vm6, %v1063_v47, %v469_v56 }
 0x165   : > { %v474_v58 = vmul.f32 %v473_v57, %v1539_v18  ;;  %v1057_v18 = vld [vmem:[#allocation7 + $0x2] ss:$0 sm:$0xff] }
 0x167   : > { %v475_v59 = vpack.c.bf16 %v474_v58, %v474_v58 }
 0x169   : > { %595 = vmatmul.bf16.vlgmr.msra.gmra.mxu1 %v475_v59 }
 0x1de   : > { %v534_v4 = vpop.f32.mrf.mxu0 }
 0x1df   : > { %v535_v5 = vadd.f32 %v1055_v3, %v534_v4 }
 0x1e1   : > { %v600_v6 = vsub.f32 0.0, %v535_v5 }
 0x1e3   : > { %v601_v7 = vmul.f32 1.442695, %v600_v6 }
 0x1e5   : > { %1064 = vpow2.f32 %v601_v7 }
 0x1e6   : > { %v536_v8 = vpop.f32.mrf.mxu0  ;;  %v596_v9 = vpop.f32.mrf.mxu1 }
 0x1e7   : > { %v597_v14 = vadd.f32 %v1056_v13, %v596_v9 }
 0x1eb   : > { %v1065_v10 = vpop.eup %1064 }
 0x1ec   : > { %v603_v11 = vadd.f32 1.0, %v1065_v10 }
 0x1ee   : > { %1066 = vrcp.f32 %v603_v11  ;;  %v598_v12 = vpop.f32.mrf.mxu1 }
 0x1f4   : > { %v1067_v15 = vpop.eup %1066 }
 0x1f5   : > { %v605_v16 = vmul.f32 %v1067_v15, %v597_v14 }
 0x1f7   : > { %v606_v17 = vpack.c.bf16 %v605_v16, %v605_v16 }
 0x1f9   : > { %664 = vmatmul.bf16.vlgmr.msra.gmra.mxu2 %v606_v17 }
 0x27c   : > { %v665_v19 = vpop.f32.mrf.mxu2 }
 0x27d   : > { %v666_v20 = vadd.f32 %v1057_v18, %v665_v19 }
 0x27f   : > { %669 = vst [vmem:[%s371_s19] sm:$0xff] %v666_v20 }
 0x280   : > { %1275 = shalt.err (!%p1272_p10)
}
 0x281   : > { %980 = dma.vmem_to_hbm [thread:$0]  (%p1461_p5), %s684_s16, 128, %s686_s26, %s671_s20  }
 0x284   : > { %v667_v21 = vpop.f32.mrf.mxu2 }
 0x285 PF: > { %s697_s2 = sand.u32 1, %s1318_s21   ;;  %p1601_p11 = scmp.ge.s32.totalorder %s1330_s24, 2 }
 0x286   : > { %s698_s30 = scalar_lea.sflag [#allocation4], %s697_s2 }
 0x287   : > { %p1003_p4 = pnand %p1601_p11, %p1465_p6 }
 0x289   : > { %p1004_p13 = pneg %p1003_p4 }
 0x28b   : > { %1313 = dma.done.wait (%p1004_p13), %s698_s30, 128  }
 0x28c   : > { %1315 = vsyncadd (%p1004_p13), %s698_s30, 4294967168  ;;  %s1602_s5 = sld [smem:[#allocation20_spill]]  ;;  %p24_p0 = scmp.ge.s32.totalorder %s1435_s9, 4  }
 0x28d   : > { %s1603_s21 = smov %s1322_s22  ;;  %s1604_s22 = smov %s1326_s23 }
 0x28e   : > { %s1606_s24 = smov %s1435_s9  ;;  %26 = sbr.rel (!%p24_p0) target bundleno = 14 (0xe), region = 118 }
 0x292   : > { %s1605_s23 = smov %s1602_s5 }
 0x293   :  { %704 = vsyncpa [#allocation3], 1 }
 0x294   :  { %706 = vsyncpa [#allocation3 + $0x1], 1 }
 0x295   :  { %707 = vsyncpa [#allocation6], 1 }
 0x296   :  { %709 = vsyncpa [#allocation6 + $0x1], 1 }
 0x297   :  { %710 = vsyncpa [#allocation9], 1 }
 0x298   :  { %711 = vsyncpa [#allocation12], 1 }
 0x299   :  { %712 = vsyncpa [#allocation4], 1 }
 0x29a   :  { %714 = vsyncpa [#allocation4 + $0x1], 1 }

</bundles_post_ra>
